<compile_context>
chip_gen: v5e
topology: v5e:2x2
jax: 0.10.0
libtpu: 0.0.40
codegen_flags: <defaults>
</compile_context>

<pallas_src>
import jax
import jax.numpy as jnp
from jax.experimental import pallas as pl
from jax.experimental.pallas import tpu as pltpu


def _policy_kernel(scal_ref, w_ref, xt_ref, o_ref):
    # scal_ref (SMEM f32[2]): [override_flag, beta * override_value]
    # w_ref    (SMEM f32[F]): beta * conv weights
    # xt_ref   (VMEM f32[F, N, TB]): features x actions x states (lane-major states)
    # o_ref    (VMEM f32[N, TB]): per-state softmax over actions
    F = xt_ref.shape[0]

    # Conv1d(1, 1, kernel_size=F, bias=False) == per-action dot product.
    # F scalar-broadcast MACs on the VPU; accumulator is one (N, TB) tile, so no
    # large intermediate (F, N, TB) product is ever materialized.
    scores = xt_ref[0] * w_ref[0]
    for f in range(1, F):                       # F is static -> unrolled at trace time
        scores = scores + xt_ref[f] * w_ref[f]  # (N, TB)

    # Fused override of action 0 (sublane 0): term_reward and/or termination=False,
    # resolved on the host into a single (flag, beta*value) pair.
    flag = scal_ref[0]
    oval = scal_ref[1]
    row = jax.lax.broadcasted_iota(jnp.int32, scores.shape, 0)
    scores = jnp.where(jnp.logical_and(row == 0, flag > 0.5), oval, scores)

    # Softmax over actions (cross-sublane reduce), single exact normalization.
    m = jnp.max(scores, axis=0, keepdims=True)       # (1, TB)
    e = jnp.exp(scores - m)                          # (N, TB)
    s = jnp.sum(e, axis=0, keepdims=True)            # (1, TB)
    o_ref[...] = e / s


def _pack_scalars(beta, term_reward, termination):
    # Mirror PyTorch truthiness: `if term_reward:` (so 0.0 / None do not override),
    # and `if not termination:` (which wins over term_reward).  beta is folded in.
    # TODO(synk): beta == 0 with termination=False gives 0 * (-inf) = NaN, exactly
    # like the PyTorch module; unsupported edge case.
    apply_override = (not termination) or bool(term_reward)
    if not termination:
        override_val = -float("inf")
    elif term_reward:
        override_val = float(term_reward)
    else:
        override_val = 0.0
    return jnp.array(
        [1.0 if apply_override else 0.0, float(beta) * override_val],
        dtype=jnp.float32,
    )


def _choose_tb(B, max_tb=512):
    """Pick a lane-dense batch tile TB (multiple of 128) and the padded batch."""
    bp128 = ((B + 127) // 128) * 128
    tb = min(max_tb, bp128)
    # Prefer >= 2 grid steps when the batch is big enough (v7x has 2 TensorCores).
    if bp128 // tb < 2 and bp128 >= 256:
        tb = max(128, ((bp128 // 2) // 128) * 128)
    bp = ((bp128 + tb - 1) // tb) * tb
    return tb, bp


def policy_forward_batched(x, conv_weight, beta, term_reward=None, termination=True,
                           max_block_b=512):
    """Batched forward: x (B, N, 1, F) -> (B, N, 1, 1).

    term_reward / termination are Python scalars applied uniformly to all B states
    (same restriction as calling the PyTorch module with fixed kwargs).
    """
    B, N, C, F = x.shape
    assert C == 1
    tb, bp = _choose_tb(B, max_block_b)

    # Lane-dense layout: (F, N, B) with states on lanes, actions on sublanes.
    # TODO(synk): if the caller can produce x in (F, N, B) layout upstream, this
    # wrapper transpose (an extra HBM round-trip) disappears.
    xt = jnp.transpose(x.reshape(B, N, F), (2, 1, 0)).astype(jnp.float32)
    if bp != B:
        xt = jnp.pad(xt, ((0, 0), (0, 0), (0, bp - B)))

    w = (jnp.float32(beta) * conv_weight.reshape(F)).astype(jnp.float32)  # beta folded
    scal = _pack_scalars(beta, term_reward, termination)

    out = pl.pallas_call(
        _policy_kernel,
        out_shape=jax.ShapeDtypeStruct((N, bp), jnp.float32),
        grid=(bp // tb,),
        in_specs=[
            pl.BlockSpec(memory_space=pltpu.SMEM),            # [flag, beta*override]
            pl.BlockSpec(memory_space=pltpu.SMEM),            # beta * conv weights
            pl.BlockSpec((F, N, tb), lambda b: (0, 0, b)),     # (F, N, TB) slab
        ],
        out_specs=pl.BlockSpec((N, tb), lambda b: (0, b)),     # lane-dense output slab
        compiler_params=pltpu.CompilerParams(
            dimension_semantics=("parallel",)),
    )(scal, w, xt)

    return out[:, :B].T.reshape(B, N, 1, 1)


def policy_forward(x, conv_weight, beta, term_reward=None, termination=True):
    """Single forward.  x: (N, 1, F) float32; conv_weight: (1, 1, F) (Conv1d weight)."""
    # TODO(synk): the PyTorch forward asserts x has no NaN/Inf; that host-side
    # check is omitted here.
    # Route through the batched kernel (one padded lane-dense grid step).
    return policy_forward_batched(x[None], conv_weight, beta, term_reward, termination)[0]


def _reference(x, conv_weight, beta, term_reward=None, termination=True):
    """Pure-JAX reference mirroring the PyTorch forward."""
    N, _, F = x.shape
    y = jnp.einsum("ncf,f->n", x, conv_weight.reshape(F))[:, None, None]
    if term_reward:
        y = y.at[0, 0].set(float(term_reward))
    if not termination:
        y = y.at[0, 0].set(-jnp.inf)
    scores = beta * y
    sm = jnp.exp(jax.nn.log_softmax(scores, axis=0))
    return sm / jnp.sum(sm)


if __name__ == "__main__":
    num_features = 32   # Conv1d kernel_size
    num_actions = 8     # action dim N of the feature matrix
    beta = 2.0

    key = jax.random.PRNGKey(0)
    kx, kw, kb = jax.random.split(key, 3)
    x = jax.random.normal(kx, (num_actions, 1, num_features), dtype=jnp.float32)
    # Deterministic Conv1d-weight init (synthetic, not a checkpoint load).
    bound = 1.0 / jnp.sqrt(jnp.float32(num_features))
    conv_weight = jax.random.uniform(
        kw, (1, 1, num_features), dtype=jnp.float32, minval=-bound, maxval=bound
    )

    # Default forward.
    probs = jax.block_until_ready(policy_forward(x, conv_weight, beta))
    ref = _reference(x, conv_weight, beta)
    assert probs.shape == (num_actions, 1, 1)
    assert jnp.allclose(probs, ref, atol=1e-5, rtol=1e-5)

    # Forward with term_reward override on action 0.
    probs_tr = jax.block_until_ready(
        policy_forward(x, conv_weight, beta, term_reward=5.0))
    ref_tr = _reference(x, conv_weight, beta, term_reward=5.0)
    assert jnp.allclose(probs_tr, ref_tr, atol=1e-5, rtol=1e-5)

    # Forward with termination disabled (action 0 masked to -inf).
    probs_nt = jax.block_until_ready(
        policy_forward(x, conv_weight, beta, termination=False))
    ref_nt = _reference(x, conv_weight, beta, termination=False)
    assert jnp.allclose(probs_nt, ref_nt, atol=1e-5, rtol=1e-5)

    # Batched path: many policy evaluations in one lane-dense pallas_call
    # (B=256 -> two parallel grid steps of 128 states each).
    B = 256
    xb = jax.random.normal(kb, (B, num_actions, 1, num_features), dtype=jnp.float32)
    probs_b = jax.block_until_ready(policy_forward_batched(xb, conv_weight, beta))
    ref_b = jax.vmap(lambda xi: _reference(xi, conv_weight, beta))(xb)
    assert probs_b.shape == (B, num_actions, 1, 1)
    assert jnp.allclose(probs_b, ref_b, atol=1e-5, rtol=1e-5)

    # Batched path with the termination override applied to every state.
    probs_bt = jax.block_until_ready(
        policy_forward_batched(xb, conv_weight, beta, termination=False))
    ref_bt = jax.vmap(lambda xi: _reference(xi, conv_weight, beta, termination=False))(xb)
    assert jnp.allclose(probs_bt, ref_bt, atol=1e-5, rtol=1e-5)

    print("KERNEL_OK")
</pallas_src>

<mosaic_0001>
module attributes {stable_mosaic.version = 11 : i64} {
  func.func @_policy_kernel(%arg0: i32, %arg1: memref<2xf32, #tpu.memory_space<smem>>, %arg2: memref<32xf32, #tpu.memory_space<smem>>, %arg3: memref<32x8x128xf32, #tpu.memory_space<vmem>>, %arg4: memref<8x128xf32, #tpu.memory_space<vmem>>) attributes {dimension_semantics = [#tpu.dimension_semantics<parallel>], iteration_bounds = array<i64: 1>, scalar_prefetch = 0 : i64, scratch_operands = 0 : i64, tpu.core_type = #tpu.core_type<tc>, window_params = [{transform_indices = @transform_0, window_bounds = array<i64: 2>}, {transform_indices = @transform_1, window_bounds = array<i64: 32>}, {transform_indices = @transform_2, window_bounds = array<i64: 32, 8, 128>}, {transform_indices = @transform_3, window_bounds = array<i64: 8, 128>}]} {
    %c0 = arith.constant 0 : index
    %c0_0 = arith.constant 0 : index
    %c0_1 = arith.constant 0 : index
    %0 = vector.load %arg3[%c0, %c0_0, %c0_1] : memref<32x8x128xf32, #tpu.memory_space<vmem>>, vector<1x8x128xf32>
    %1 = vector.shape_cast %0 : vector<1x8x128xf32> to vector<8x128xf32>
    %c0_2 = arith.constant 0 : index
    %2 = memref.load %arg2[%c0_2] : memref<32xf32, #tpu.memory_space<smem>>
    %3 = vector.broadcast %2 : f32 to vector<8x128xf32>
    %4 = arith.mulf %1, %3 : vector<8x128xf32>
    %c1 = arith.constant 1 : index
    %c0_3 = arith.constant 0 : index
    %c0_4 = arith.constant 0 : index
    %5 = vector.load %arg3[%c1, %c0_3, %c0_4] : memref<32x8x128xf32, #tpu.memory_space<vmem>>, vector<1x8x128xf32>
    %6 = vector.shape_cast %5 : vector<1x8x128xf32> to vector<8x128xf32>
    %c1_5 = arith.constant 1 : index
    %7 = memref.load %arg2[%c1_5] : memref<32xf32, #tpu.memory_space<smem>>
    %8 = vector.broadcast %7 : f32 to vector<8x128xf32>
    %9 = arith.mulf %6, %8 : vector<8x128xf32>
    %10 = arith.addf %4, %9 : vector<8x128xf32>
    %c2 = arith.constant 2 : index
    %c0_6 = arith.constant 0 : index
    %c0_7 = arith.constant 0 : index
    %11 = vector.load %arg3[%c2, %c0_6, %c0_7] : memref<32x8x128xf32, #tpu.memory_space<vmem>>, vector<1x8x128xf32>
    %12 = vector.shape_cast %11 : vector<1x8x128xf32> to vector<8x128xf32>
    %c2_8 = arith.constant 2 : index
    %13 = memref.load %arg2[%c2_8] : memref<32xf32, #tpu.memory_space<smem>>
    %14 = vector.broadcast %13 : f32 to vector<8x128xf32>
    %15 = arith.mulf %12, %14 : vector<8x128xf32>
    %16 = arith.addf %10, %15 : vector<8x128xf32>
    %c3 = arith.constant 3 : index
    %c0_9 = arith.constant 0 : index
    %c0_10 = arith.constant 0 : index
    %17 = vector.load %arg3[%c3, %c0_9, %c0_10] : memref<32x8x128xf32, #tpu.memory_space<vmem>>, vector<1x8x128xf32>
    %18 = vector.shape_cast %17 : vector<1x8x128xf32> to vector<8x128xf32>
    %c3_11 = arith.constant 3 : index
    %19 = memref.load %arg2[%c3_11] : memref<32xf32, #tpu.memory_space<smem>>
    %20 = vector.broadcast %19 : f32 to vector<8x128xf32>
    %21 = arith.mulf %18, %20 : vector<8x128xf32>
    %22 = arith.addf %16, %21 : vector<8x128xf32>
    %c4 = arith.constant 4 : index
    %c0_12 = arith.constant 0 : index
    %c0_13 = arith.constant 0 : index
    %23 = vector.load %arg3[%c4, %c0_12, %c0_13] : memref<32x8x128xf32, #tpu.memory_space<vmem>>, vector<1x8x128xf32>
    %24 = vector.shape_cast %23 : vector<1x8x128xf32> to vector<8x128xf32>
    %c4_14 = arith.constant 4 : index
    %25 = memref.load %arg2[%c4_14] : memref<32xf32, #tpu.memory_space<smem>>
    %26 = vector.broadcast %25 : f32 to vector<8x128xf32>
    %27 = arith.mulf %24, %26 : vector<8x128xf32>
    %28 = arith.addf %22, %27 : vector<8x128xf32>
    %c5 = arith.constant 5 : index
    %c0_15 = arith.constant 0 : index
    %c0_16 = arith.constant 0 : index
    %29 = vector.load %arg3[%c5, %c0_15, %c0_16] : memref<32x8x128xf32, #tpu.memory_space<vmem>>, vector<1x8x128xf32>
    %30 = vector.shape_cast %29 : vector<1x8x128xf32> to vector<8x128xf32>
    %c5_17 = arith.constant 5 : index
    %31 = memref.load %arg2[%c5_17] : memref<32xf32, #tpu.memory_space<smem>>
    %32 = vector.broadcast %31 : f32 to vector<8x128xf32>
    %33 = arith.mulf %30, %32 : vector<8x128xf32>
    %34 = arith.addf %28, %33 : vector<8x128xf32>
    %c6 = arith.constant 6 : index
    %c0_18 = arith.constant 0 : index
    %c0_19 = arith.constant 0 : index
    %35 = vector.load %arg3[%c6, %c0_18, %c0_19] : memref<32x8x128xf32, #tpu.memory_space<vmem>>, vector<1x8x128xf32>
    %36 = vector.shape_cast %35 : vector<1x8x128xf32> to vector<8x128xf32>
    %c6_20 = arith.constant 6 : index
    %37 = memref.load %arg2[%c6_20] : memref<32xf32, #tpu.memory_space<smem>>
    %38 = vector.broadcast %37 : f32 to vector<8x128xf32>
    %39 = arith.mulf %36, %38 : vector<8x128xf32>
    %40 = arith.addf %34, %39 : vector<8x128xf32>
    %c7 = arith.constant 7 : index
    %c0_21 = arith.constant 0 : index
    %c0_22 = arith.constant 0 : index
    %41 = vector.load %arg3[%c7, %c0_21, %c0_22] : memref<32x8x128xf32, #tpu.memory_space<vmem>>, vector<1x8x128xf32>
    %42 = vector.shape_cast %41 : vector<1x8x128xf32> to vector<8x128xf32>
    %c7_23 = arith.constant 7 : index
    %43 = memref.load %arg2[%c7_23] : memref<32xf32, #tpu.memory_space<smem>>
    %44 = vector.broadcast %43 : f32 to vector<8x128xf32>
    %45 = arith.mulf %42, %44 : vector<8x128xf32>
    %46 = arith.addf %40, %45 : vector<8x128xf32>
    %c8 = arith.constant 8 : index
    %c0_24 = arith.constant 0 : index
    %c0_25 = arith.constant 0 : index
    %47 = vector.load %arg3[%c8, %c0_24, %c0_25] : memref<32x8x128xf32, #tpu.memory_space<vmem>>, vector<1x8x128xf32>
    %48 = vector.shape_cast %47 : vector<1x8x128xf32> to vector<8x128xf32>
    %c8_26 = arith.constant 8 : index
    %49 = memref.load %arg2[%c8_26] : memref<32xf32, #tpu.memory_space<smem>>
    %50 = vector.broadcast %49 : f32 to vector<8x128xf32>
    %51 = arith.mulf %48, %50 : vector<8x128xf32>
    %52 = arith.addf %46, %51 : vector<8x128xf32>
    %c9 = arith.constant 9 : index
    %c0_27 = arith.constant 0 : index
    %c0_28 = arith.constant 0 : index
    %53 = vector.load %arg3[%c9, %c0_27, %c0_28] : memref<32x8x128xf32, #tpu.memory_space<vmem>>, vector<1x8x128xf32>
    %54 = vector.shape_cast %53 : vector<1x8x128xf32> to vector<8x128xf32>
    %c9_29 = arith.constant 9 : index
    %55 = memref.load %arg2[%c9_29] : memref<32xf32, #tpu.memory_space<smem>>
    %56 = vector.broadcast %55 : f32 to vector<8x128xf32>
    %57 = arith.mulf %54, %56 : vector<8x128xf32>
    %58 = arith.addf %52, %57 : vector<8x128xf32>
    %c10 = arith.constant 10 : index
    %c0_30 = arith.constant 0 : index
    %c0_31 = arith.constant 0 : index
    %59 = vector.load %arg3[%c10, %c0_30, %c0_31] : memref<32x8x128xf32, #tpu.memory_space<vmem>>, vector<1x8x128xf32>
    %60 = vector.shape_cast %59 : vector<1x8x128xf32> to vector<8x128xf32>
    %c10_32 = arith.constant 10 : index
    %61 = memref.load %arg2[%c10_32] : memref<32xf32, #tpu.memory_space<smem>>
    %62 = vector.broadcast %61 : f32 to vector<8x128xf32>
    %63 = arith.mulf %60, %62 : vector<8x128xf32>
    %64 = arith.addf %58, %63 : vector<8x128xf32>
    %c11 = arith.constant 11 : index
    %c0_33 = arith.constant 0 : index
    %c0_34 = arith.constant 0 : index
    %65 = vector.load %arg3[%c11, %c0_33, %c0_34] : memref<32x8x128xf32, #tpu.memory_space<vmem>>, vector<1x8x128xf32>
    %66 = vector.shape_cast %65 : vector<1x8x128xf32> to vector<8x128xf32>
    %c11_35 = arith.constant 11 : index
    %67 = memref.load %arg2[%c11_35] : memref<32xf32, #tpu.memory_space<smem>>
    %68 = vector.broadcast %67 : f32 to vector<8x128xf32>
    %69 = arith.mulf %66, %68 : vector<8x128xf32>
    %70 = arith.addf %64, %69 : vector<8x128xf32>
    %c12 = arith.constant 12 : index
    %c0_36 = arith.constant 0 : index
    %c0_37 = arith.constant 0 : index
    %71 = vector.load %arg3[%c12, %c0_36, %c0_37] : memref<32x8x128xf32, #tpu.memory_space<vmem>>, vector<1x8x128xf32>
    %72 = vector.shape_cast %71 : vector<1x8x128xf32> to vector<8x128xf32>
    %c12_38 = arith.constant 12 : index
    %73 = memref.load %arg2[%c12_38] : memref<32xf32, #tpu.memory_space<smem>>
    %74 = vector.broadcast %73 : f32 to vector<8x128xf32>
    %75 = arith.mulf %72, %74 : vector<8x128xf32>
    %76 = arith.addf %70, %75 : vector<8x128xf32>
    %c13 = arith.constant 13 : index
    %c0_39 = arith.constant 0 : index
    %c0_40 = arith.constant 0 : index
    %77 = vector.load %arg3[%c13, %c0_39, %c0_40] : memref<32x8x128xf32, #tpu.memory_space<vmem>>, vector<1x8x128xf32>
    %78 = vector.shape_cast %77 : vector<1x8x128xf32> to vector<8x128xf32>
    %c13_41 = arith.constant 13 : index
    %79 = memref.load %arg2[%c13_41] : memref<32xf32, #tpu.memory_space<smem>>
    %80 = vector.broadcast %79 : f32 to vector<8x128xf32>
    %81 = arith.mulf %78, %80 : vector<8x128xf32>
    %82 = arith.addf %76, %81 : vector<8x128xf32>
    %c14 = arith.constant 14 : index
    %c0_42 = arith.constant 0 : index
    %c0_43 = arith.constant 0 : index
    %83 = vector.load %arg3[%c14, %c0_42, %c0_43] : memref<32x8x128xf32, #tpu.memory_space<vmem>>, vector<1x8x128xf32>
    %84 = vector.shape_cast %83 : vector<1x8x128xf32> to vector<8x128xf32>
    %c14_44 = arith.constant 14 : index
    %85 = memref.load %arg2[%c14_44] : memref<32xf32, #tpu.memory_space<smem>>
    %86 = vector.broadcast %85 : f32 to vector<8x128xf32>
    %87 = arith.mulf %84, %86 : vector<8x128xf32>
    %88 = arith.addf %82, %87 : vector<8x128xf32>
    %c15 = arith.constant 15 : index
    %c0_45 = arith.constant 0 : index
    %c0_46 = arith.constant 0 : index
    %89 = vector.load %arg3[%c15, %c0_45, %c0_46] : memref<32x8x128xf32, #tpu.memory_space<vmem>>, vector<1x8x128xf32>
    %90 = vector.shape_cast %89 : vector<1x8x128xf32> to vector<8x128xf32>
    %c15_47 = arith.constant 15 : index
    %91 = memref.load %arg2[%c15_47] : memref<32xf32, #tpu.memory_space<smem>>
    %92 = vector.broadcast %91 : f32 to vector<8x128xf32>
    %93 = arith.mulf %90, %92 : vector<8x128xf32>
    %94 = arith.addf %88, %93 : vector<8x128xf32>
    %c16 = arith.constant 16 : index
    %c0_48 = arith.constant 0 : index
    %c0_49 = arith.constant 0 : index
    %95 = vector.load %arg3[%c16, %c0_48, %c0_49] : memref<32x8x128xf32, #tpu.memory_space<vmem>>, vector<1x8x128xf32>
    %96 = vector.shape_cast %95 : vector<1x8x128xf32> to vector<8x128xf32>
    %c16_50 = arith.constant 16 : index
    %97 = memref.load %arg2[%c16_50] : memref<32xf32, #tpu.memory_space<smem>>
    %98 = vector.broadcast %97 : f32 to vector<8x128xf32>
    %99 = arith.mulf %96, %98 : vector<8x128xf32>
    %100 = arith.addf %94, %99 : vector<8x128xf32>
    %c17 = arith.constant 17 : index
    %c0_51 = arith.constant 0 : index
    %c0_52 = arith.constant 0 : index
    %101 = vector.load %arg3[%c17, %c0_51, %c0_52] : memref<32x8x128xf32, #tpu.memory_space<vmem>>, vector<1x8x128xf32>
    %102 = vector.shape_cast %101 : vector<1x8x128xf32> to vector<8x128xf32>
    %c17_53 = arith.constant 17 : index
    %103 = memref.load %arg2[%c17_53] : memref<32xf32, #tpu.memory_space<smem>>
    %104 = vector.broadcast %103 : f32 to vector<8x128xf32>
    %105 = arith.mulf %102, %104 : vector<8x128xf32>
    %106 = arith.addf %100, %105 : vector<8x128xf32>
    %c18 = arith.constant 18 : index
    %c0_54 = arith.constant 0 : index
    %c0_55 = arith.constant 0 : index
    %107 = vector.load %arg3[%c18, %c0_54, %c0_55] : memref<32x8x128xf32, #tpu.memory_space<vmem>>, vector<1x8x128xf32>
    %108 = vector.shape_cast %107 : vector<1x8x128xf32> to vector<8x128xf32>
    %c18_56 = arith.constant 18 : index
    %109 = memref.load %arg2[%c18_56] : memref<32xf32, #tpu.memory_space<smem>>
    %110 = vector.broadcast %109 : f32 to vector<8x128xf32>
    %111 = arith.mulf %108, %110 : vector<8x128xf32>
    %112 = arith.addf %106, %111 : vector<8x128xf32>
    %c19 = arith.constant 19 : index
    %c0_57 = arith.constant 0 : index
    %c0_58 = arith.constant 0 : index
    %113 = vector.load %arg3[%c19, %c0_57, %c0_58] : memref<32x8x128xf32, #tpu.memory_space<vmem>>, vector<1x8x128xf32>
    %114 = vector.shape_cast %113 : vector<1x8x128xf32> to vector<8x128xf32>
    %c19_59 = arith.constant 19 : index
    %115 = memref.load %arg2[%c19_59] : memref<32xf32, #tpu.memory_space<smem>>
    %116 = vector.broadcast %115 : f32 to vector<8x128xf32>
    %117 = arith.mulf %114, %116 : vector<8x128xf32>
    %118 = arith.addf %112, %117 : vector<8x128xf32>
    %c20 = arith.constant 20 : index
    %c0_60 = arith.constant 0 : index
    %c0_61 = arith.constant 0 : index
    %119 = vector.load %arg3[%c20, %c0_60, %c0_61] : memref<32x8x128xf32, #tpu.memory_space<vmem>>, vector<1x8x128xf32>
    %120 = vector.shape_cast %119 : vector<1x8x128xf32> to vector<8x128xf32>
    %c20_62 = arith.constant 20 : index
    %121 = memref.load %arg2[%c20_62] : memref<32xf32, #tpu.memory_space<smem>>
    %122 = vector.broadcast %121 : f32 to vector<8x128xf32>
    %123 = arith.mulf %120, %122 : vector<8x128xf32>
    %124 = arith.addf %118, %123 : vector<8x128xf32>
    %c21 = arith.constant 21 : index
    %c0_63 = arith.constant 0 : index
    %c0_64 = arith.constant 0 : index
    %125 = vector.load %arg3[%c21, %c0_63, %c0_64] : memref<32x8x128xf32, #tpu.memory_space<vmem>>, vector<1x8x128xf32>
    %126 = vector.shape_cast %125 : vector<1x8x128xf32> to vector<8x128xf32>
    %c21_65 = arith.constant 21 : index
    %127 = memref.load %arg2[%c21_65] : memref<32xf32, #tpu.memory_space<smem>>
    %128 = vector.broadcast %127 : f32 to vector<8x128xf32>
    %129 = arith.mulf %126, %128 : vector<8x128xf32>
    %130 = arith.addf %124, %129 : vector<8x128xf32>
    %c22 = arith.constant 22 : index
    %c0_66 = arith.constant 0 : index
    %c0_67 = arith.constant 0 : index
    %131 = vector.load %arg3[%c22, %c0_66, %c0_67] : memref<32x8x128xf32, #tpu.memory_space<vmem>>, vector<1x8x128xf32>
    %132 = vector.shape_cast %131 : vector<1x8x128xf32> to vector<8x128xf32>
    %c22_68 = arith.constant 22 : index
    %133 = memref.load %arg2[%c22_68] : memref<32xf32, #tpu.memory_space<smem>>
    %134 = vector.broadcast %133 : f32 to vector<8x128xf32>
    %135 = arith.mulf %132, %134 : vector<8x128xf32>
    %136 = arith.addf %130, %135 : vector<8x128xf32>
    %c23 = arith.constant 23 : index
    %c0_69 = arith.constant 0 : index
    %c0_70 = arith.constant 0 : index
    %137 = vector.load %arg3[%c23, %c0_69, %c0_70] : memref<32x8x128xf32, #tpu.memory_space<vmem>>, vector<1x8x128xf32>
    %138 = vector.shape_cast %137 : vector<1x8x128xf32> to vector<8x128xf32>
    %c23_71 = arith.constant 23 : index
    %139 = memref.load %arg2[%c23_71] : memref<32xf32, #tpu.memory_space<smem>>
    %140 = vector.broadcast %139 : f32 to vector<8x128xf32>
    %141 = arith.mulf %138, %140 : vector<8x128xf32>
    %142 = arith.addf %136, %141 : vector<8x128xf32>
    %c24 = arith.constant 24 : index
    %c0_72 = arith.constant 0 : index
    %c0_73 = arith.constant 0 : index
    %143 = vector.load %arg3[%c24, %c0_72, %c0_73] : memref<32x8x128xf32, #tpu.memory_space<vmem>>, vector<1x8x128xf32>
    %144 = vector.shape_cast %143 : vector<1x8x128xf32> to vector<8x128xf32>
    %c24_74 = arith.constant 24 : index
    %145 = memref.load %arg2[%c24_74] : memref<32xf32, #tpu.memory_space<smem>>
    %146 = vector.broadcast %145 : f32 to vector<8x128xf32>
    %147 = arith.mulf %144, %146 : vector<8x128xf32>
    %148 = arith.addf %142, %147 : vector<8x128xf32>
    %c25 = arith.constant 25 : index
    %c0_75 = arith.constant 0 : index
    %c0_76 = arith.constant 0 : index
    %149 = vector.load %arg3[%c25, %c0_75, %c0_76] : memref<32x8x128xf32, #tpu.memory_space<vmem>>, vector<1x8x128xf32>
    %150 = vector.shape_cast %149 : vector<1x8x128xf32> to vector<8x128xf32>
    %c25_77 = arith.constant 25 : index
    %151 = memref.load %arg2[%c25_77] : memref<32xf32, #tpu.memory_space<smem>>
    %152 = vector.broadcast %151 : f32 to vector<8x128xf32>
    %153 = arith.mulf %150, %152 : vector<8x128xf32>
    %154 = arith.addf %148, %153 : vector<8x128xf32>
    %c26 = arith.constant 26 : index
    %c0_78 = arith.constant 0 : index
    %c0_79 = arith.constant 0 : index
    %155 = vector.load %arg3[%c26, %c0_78, %c0_79] : memref<32x8x128xf32, #tpu.memory_space<vmem>>, vector<1x8x128xf32>
    %156 = vector.shape_cast %155 : vector<1x8x128xf32> to vector<8x128xf32>
    %c26_80 = arith.constant 26 : index
    %157 = memref.load %arg2[%c26_80] : memref<32xf32, #tpu.memory_space<smem>>
    %158 = vector.broadcast %157 : f32 to vector<8x128xf32>
    %159 = arith.mulf %156, %158 : vector<8x128xf32>
    %160 = arith.addf %154, %159 : vector<8x128xf32>
    %c27 = arith.constant 27 : index
    %c0_81 = arith.constant 0 : index
    %c0_82 = arith.constant 0 : index
    %161 = vector.load %arg3[%c27, %c0_81, %c0_82] : memref<32x8x128xf32, #tpu.memory_space<vmem>>, vector<1x8x128xf32>
    %162 = vector.shape_cast %161 : vector<1x8x128xf32> to vector<8x128xf32>
    %c27_83 = arith.constant 27 : index
    %163 = memref.load %arg2[%c27_83] : memref<32xf32, #tpu.memory_space<smem>>
    %164 = vector.broadcast %163 : f32 to vector<8x128xf32>
    %165 = arith.mulf %162, %164 : vector<8x128xf32>
    %166 = arith.addf %160, %165 : vector<8x128xf32>
    %c28 = arith.constant 28 : index
    %c0_84 = arith.constant 0 : index
    %c0_85 = arith.constant 0 : index
    %167 = vector.load %arg3[%c28, %c0_84, %c0_85] : memref<32x8x128xf32, #tpu.memory_space<vmem>>, vector<1x8x128xf32>
    %168 = vector.shape_cast %167 : vector<1x8x128xf32> to vector<8x128xf32>
    %c28_86 = arith.constant 28 : index
    %169 = memref.load %arg2[%c28_86] : memref<32xf32, #tpu.memory_space<smem>>
    %170 = vector.broadcast %169 : f32 to vector<8x128xf32>
    %171 = arith.mulf %168, %170 : vector<8x128xf32>
    %172 = arith.addf %166, %171 : vector<8x128xf32>
    %c29 = arith.constant 29 : index
    %c0_87 = arith.constant 0 : index
    %c0_88 = arith.constant 0 : index
    %173 = vector.load %arg3[%c29, %c0_87, %c0_88] : memref<32x8x128xf32, #tpu.memory_space<vmem>>, vector<1x8x128xf32>
    %174 = vector.shape_cast %173 : vector<1x8x128xf32> to vector<8x128xf32>
    %c29_89 = arith.constant 29 : index
    %175 = memref.load %arg2[%c29_89] : memref<32xf32, #tpu.memory_space<smem>>
    %176 = vector.broadcast %175 : f32 to vector<8x128xf32>
    %177 = arith.mulf %174, %176 : vector<8x128xf32>
    %178 = arith.addf %172, %177 : vector<8x128xf32>
    %c30 = arith.constant 30 : index
    %c0_90 = arith.constant 0 : index
    %c0_91 = arith.constant 0 : index
    %179 = vector.load %arg3[%c30, %c0_90, %c0_91] : memref<32x8x128xf32, #tpu.memory_space<vmem>>, vector<1x8x128xf32>
    %180 = vector.shape_cast %179 : vector<1x8x128xf32> to vector<8x128xf32>
    %c30_92 = arith.constant 30 : index
    %181 = memref.load %arg2[%c30_92] : memref<32xf32, #tpu.memory_space<smem>>
    %182 = vector.broadcast %181 : f32 to vector<8x128xf32>
    %183 = arith.mulf %180, %182 : vector<8x128xf32>
    %184 = arith.addf %178, %183 : vector<8x128xf32>
    %c31 = arith.constant 31 : index
    %c0_93 = arith.constant 0 : index
    %c0_94 = arith.constant 0 : index
    %185 = vector.load %arg3[%c31, %c0_93, %c0_94] : memref<32x8x128xf32, #tpu.memory_space<vmem>>, vector<1x8x128xf32>
    %186 = vector.shape_cast %185 : vector<1x8x128xf32> to vector<8x128xf32>
    %c31_95 = arith.constant 31 : index
    %187 = memref.load %arg2[%c31_95] : memref<32xf32, #tpu.memory_space<smem>>
    %188 = vector.broadcast %187 : f32 to vector<8x128xf32>
    %189 = arith.mulf %186, %188 : vector<8x128xf32>
    %190 = arith.addf %184, %189 : vector<8x128xf32>
    %c0_96 = arith.constant 0 : index
    %191 = memref.load %arg1[%c0_96] : memref<2xf32, #tpu.memory_space<smem>>
    %c1_97 = arith.constant 1 : index
    %192 = memref.load %arg1[%c1_97] : memref<2xf32, #tpu.memory_space<smem>>
    %193 = tpu.iota {dimensions = array<i32: 0>} : vector<8x128xi32>
    %c0_i32 = arith.constant 0 : i32
    %194 = vector.broadcast %c0_i32 : i32 to vector<8x128xi32>
    %195 = arith.cmpi eq, %193, %194 : vector<8x128xi32>
    %cst = arith.constant 5.000000e-01 : f32
    %196 = arith.cmpf ogt, %191, %cst : f32
    %197 = vector.broadcast %196 : i1 to vector<8x128xi1>
    %198 = arith.andi %195, %197 : vector<8x128xi1>
    %199 = vector.broadcast %192 : f32 to vector<8x128xf32>
    %200 = arith.select %198, %199, %190 : vector<8x128xi1>, vector<8x128xf32>
    %cst_98 = arith.constant dense<0xFF800000> : vector<128xf32>
    %201 = vector.multi_reduction <maximumf>, %200, %cst_98 [0] : vector<8x128xf32> to vector<128xf32>
    %202 = vector.shape_cast %201 : vector<128xf32> to vector<1x128xf32>
    %203 = vector.broadcast %202 : vector<1x128xf32> to vector<8x128xf32>
    %204 = arith.subf %200, %203 : vector<8x128xf32>
    %205 = math.exp %204 : vector<8x128xf32>
    %cst_99 = arith.constant dense<0.000000e+00> : vector<128xf32>
    %206 = vector.multi_reduction <add>, %205, %cst_99 [0] : vector<8x128xf32> to vector<128xf32>
    %207 = vector.shape_cast %206 : vector<128xf32> to vector<1x128xf32>
    %208 = vector.broadcast %207 : vector<1x128xf32> to vector<8x128xf32>
    %209 = arith.divf %205, %208 : vector<8x128xf32>
    %c0_100 = arith.constant 0 : index
    %c0_101 = arith.constant 0 : index
    %210 = vector.load %arg4[%c0_100, %c0_101] : memref<8x128xf32, #tpu.memory_space<vmem>>, vector<8x128xf32>
    tpu.vector_store %arg4[%c0_100, %c0_101], %209 {strides = array<i32>} : memref<8x128xf32, #tpu.memory_space<vmem>>, vector<8x128xf32>,
    return
  }
  func.func @transform_0(%arg0: i32) -> i32 {
    %c0_i32 = arith.constant 0 : i32
    %c0_i32_0 = arith.constant 0 : i32
    return %c0_i32 : i32
  }
  func.func @transform_1(%arg0: i32) -> i32 {
    %c0_i32 = arith.constant 0 : i32
    %c0_i32_0 = arith.constant 0 : i32
    return %c0_i32 : i32
  }
  func.func @transform_2(%arg0: i32) -> (i32, i32, i32) {
    %c0_i32 = arith.constant 0 : i32
    %c0_i32_0 = arith.constant 0 : i32
    %c0_i32_1 = arith.constant 0 : i32
    return %c0_i32, %c0_i32_0, %arg0 : i32, i32, i32
  }
  func.func @transform_3(%arg0: i32) -> (i32, i32) {
    %c0_i32 = arith.constant 0 : i32
    %c0_i32_0 = arith.constant 0 : i32
    return %c0_i32, %arg0 : i32, i32
  }
}

</mosaic_0001>

<bundles_post_ra>
// kernel: tpu_custom_call.1
= control target key start
LH: loop header
LB: loop body
LE: loop exit
PB: predicated region body
PF: predicated region fallthrough
CT: control target
= control target key end

     0   :  { %8 = vsyncpa [#allocation5], 0  ;;  %s471_s0 = inlined_call_operand.hbm [shape: f32[2], index: 0, kind: input, shape index: {}]   ;;  %s472_s1 = inlined_call_operand.hbm [shape: f32[32], index: 1, kind: input, shape index: {}]   ;;  %s473_s2 = inlined_call_operand.hbm [shape: f32[32,8,128], index: 2, kind: input, shape index: {}]   ;;  %s474_s3 = inlined_call_operand.hbm [shape: f32[8,128], index: 3, kind: output, shape index: {}]  }
   0x1   :  { %9 = vsyncpa [#allocation7], 0 }
   0x2   :  { %10 = vsyncpa [#allocation3], 0 }
   0x3   :  { %11 = vsyncpa [#allocation4], 0  ;;  %s17_s14 = sshll.u32 %s471_s0, 4  ;;  %s26_s17 = sshll.u32 %s472_s1, 4  ;;  %s18_s14 = int_to_ptr.hbm [resolvable:$true] %s17_s14  ;;  %s27_s17 = int_to_ptr.hbm [resolvable:$true] %s26_s17 }
   0x4   :  { %s430_s18 = smov [#allocation2]   ;;  %s431_s19 = smov [#allocation6]  }
   0x5   :  { %20 = dma.hbm_to_smem %s18_s14, 16, %s430_s18, [#allocation5]  }
   0x6   :  { %29 = dma.hbm_to_smem %s27_s17, 16, %s431_s19, [#allocation7]  }
   0x7   :  { %s34_s22 = sshll.u32 %s473_s2, 4  ;;  %s432_s23 = smov [#allocation8]   ;;  %s35_s22 = int_to_ptr.hbm [resolvable:$true] %s34_s22 }
   0x8   :  { %s36_s24 = sshll.u32 %s432_s23, 4  ;;  %s433_s25 = smov 128   ;;  %s37_s24 = int_to_ptr.vmem [resolvable:$true] %s36_s24 }
   0x9   :  { %s434_s0 = smov 8  }
   0xa   :  { %42 = dma.hbm_to_vmem [thread:$0]  %s35_s22, 4096, %s37_s24, [#allocation3], %s433_s25, %s433_s25, %s434_s0  }
   0xb   :  { %422 = dma.done.wait [#allocation5], 16  }
   0xc   :  { %423 = vsyncadd [#allocation5], 4294967280 }
   0xd   :  { %424 = dma.done.wait [#allocation7], 16  }
   0xe   :  { %425 = vsyncadd [#allocation7], 4294967280 }
   0xf   :  { %426 = dma.done.wait [#allocation3], 4096  }
  0x10   :  { %427 = vsyncadd [#allocation3], 4294963200 }
  0x11   :  { %55 = sfence }
  0x12   :  { %s57_s1 = sld [smem:[#allocation6]]  ;;  %v56_v0 = vld [vmem:[#allocation8] sm:$0xff]  ;;  %v61_v1 = vld [vmem:[#allocation8 + $0x8] sm:$0xff]  ;;  %v67_v3 = vld [vmem:[#allocation8 + $0x10] sm:$0xff] }
  0x13   :  { %s308_s26 = sld [smem:[#allocation6 + $0x1]]  ;;  %v73_v6 = vld [vmem:[#allocation8 + $0x18] sm:$0xff]  ;;  %v79_v11 = vld [vmem:[#allocation8 + $0x20] sm:$0xff]  ;;  %v85_v15 = vld [vmem:[#allocation8 + $0x28] sm:$0xff] }
  0x14   :  { %s309_s27 = sld [smem:[#allocation6 + $0x2]]  ;;  %v91_v19 = vld [vmem:[#allocation8 + $0x30] sm:$0xff]  ;;  %v97_v23 = vld [vmem:[#allocation8 + $0x38] sm:$0xff]  ;;  %v103_v27 = vld [vmem:[#allocation8 + $0x40] sm:$0xff] }
  0x15   :  { %s310_s28 = sld [smem:[#allocation6 + $0x3]]  ;;  %v109_v31 = vld [vmem:[#allocation8 + $0x48] sm:$0xff]  ;;  %v115_v35 = vld [vmem:[#allocation8 + $0x50] sm:$0xff]  ;;  %v121_v39 = vld [vmem:[#allocation8 + $0x58] sm:$0xff] }
  0x16   :  { %s311_s2 = sld [smem:[#allocation6 + $0x4]]  ;;  %v127_v43 = vld [vmem:[#allocation8 + $0x60] sm:$0xff]  ;;  %v133_v47 = vld [vmem:[#allocation8 + $0x68] sm:$0xff]  ;;  %v139_v51 = vld [vmem:[#allocation8 + $0x70] sm:$0xff] }
  0x17   :  { %s312_s29 = sld [smem:[#allocation6 + $0x5]]  ;;  %v145_v55 = vld [vmem:[#allocation8 + $0x78] sm:$0xff]  ;;  %v151_v59 = vld [vmem:[#allocation8 + $0x80] sm:$0xff]  ;;  %v157_v63 = vld [vmem:[#allocation8 + $0x88] sm:$0xff] }
  0x18   :  { %v58_v2 = vstv %s57_s1  ;;  %s313_s30 = sld [smem:[#allocation6 + $0x6]] }
  0x19   :  { %v59_v4 = vmul.f32 %v58_v2, %v56_v0  ;;  %v63_v5 = vstv %s308_s26  ;;  %s314_s4 = sld [smem:[#allocation6 + $0x7]] }
  0x1a   :  { %v64_v7 = vmul.f32 %v63_v5, %v61_v1  ;;  %v69_v8 = vstv %s309_s27  ;;  %s315_s5 = sld [smem:[#allocation6 + $0x8]] }
  0x1b   :  { %v70_v9 = vmul.f32 %v69_v8, %v67_v3  ;;  %v75_v10 = vstv %s310_s28  ;;  %s316_s6 = sld [smem:[#allocation6 + $0x9]]  ;;  %v163_v3 = vld [vmem:[#allocation8 + $0x90] sm:$0xff] }
  0x1c   :  { %v65_v12 = vadd.f32 %v64_v7, %v59_v4  ;;  %v76_v13 = vmul.f32 %v75_v10, %v73_v6  ;;  %v81_v14 = vstv %s311_s2  ;;  %s317_s7 = sld [smem:[#allocation6 + $0xa]]  ;;  %v169_v7 = vld [vmem:[#allocation8 + $0x98] sm:$0xff] }
  0x1d   :  { %v87_v16 = vstv %s312_s29  ;;  %v82_v18 = vmul.f32 %v81_v14, %v79_v11  ;;  %s318_s8 = sld [smem:[#allocation6 + $0xb]]  ;;  %v175_v11 = vld [vmem:[#allocation8 + $0xa0] sm:$0xff]  ;;  %s435_s29 = smov [#allocation9]  }
  0x1e   :  { %v71_v17 = vadd.f32 %v70_v9, %v65_v12  ;;  %v93_v20 = vstv %s313_s30  ;;  %v88_v22 = vmul.f32 %v87_v16, %v85_v15  ;;  %s319_s9 = sld [smem:[#allocation6 + $0xc]]  ;;  %v181_v15 = vld [vmem:[#allocation8 + $0xa8] sm:$0xff]  ;;  %s294_s30 = sshll.u32 %s435_s29, 4  ;;  %s295_s30 = int_to_ptr.vmem [resolvable:$true] %s294_s30 }
  0x1f   :  { %v99_v24 = vstv %s314_s4  ;;  %v94_v26 = vmul.f32 %v93_v20, %v91_v19  ;;  %s320_s10 = sld [smem:[#allocation6 + $0xd]]  ;;  %v187_v19 = vld [vmem:[#allocation8 + $0xb0] sm:$0xff] }
  0x20   :  { %v77_v21 = vadd.f32 %v76_v13, %v71_v17  ;;  %v105_v28 = vstv %s315_s5  ;;  %v100_v30 = vmul.f32 %v99_v24, %v97_v23  ;;  %s321_s11 = sld [smem:[#allocation6 + $0xe]]  ;;  %v193_v23 = vld [vmem:[#allocation8 + $0xb8] sm:$0xff] }
  0x21   :  { %v111_v32 = vstv %s316_s6  ;;  %v106_v34 = vmul.f32 %v105_v28, %v103_v27  ;;  %s322_s12 = sld [smem:[#allocation6 + $0xf]]  ;;  %v199_v27 = vld [vmem:[#allocation8 + $0xc0] sm:$0xff]  ;;  %s296_s6 = sshll.u32 %s474_s3, 4  ;;  %s297_s6 = int_to_ptr.hbm [resolvable:$true] %s296_s6 }
  0x22   :  { %v83_v25 = vadd.f32 %v82_v18, %v77_v21  ;;  %v117_v36 = vstv %s317_s7  ;;  %v112_v38 = vmul.f32 %v111_v32, %v109_v31  ;;  %s323_s13 = sld [smem:[#allocation6 + $0x10]]  ;;  %v205_v31 = vld [vmem:[#allocation8 + $0xc8] sm:$0xff] }
  0x23   :  { %v123_v40 = vstv %s318_s8  ;;  %v118_v42 = vmul.f32 %v117_v36, %v115_v35  ;;  %s324_s14 = sld [smem:[#allocation6 + $0x11]]  ;;  %v211_v35 = vld [vmem:[#allocation8 + $0xd0] sm:$0xff] }
  0x24   :  { %v89_v29 = vadd.f32 %v88_v22, %v83_v25  ;;  %v129_v44 = vstv %s319_s9  ;;  %v124_v46 = vmul.f32 %v123_v40, %v121_v39  ;;  %s325_s15 = sld [smem:[#allocation6 + $0x12]]  ;;  %v217_v39 = vld [vmem:[#allocation8 + $0xd8] sm:$0xff] }
  0x25   :  { %v135_v48 = vstv %s320_s10  ;;  %v130_v50 = vmul.f32 %v129_v44, %v127_v43  ;;  %s326_s16 = sld [smem:[#allocation6 + $0x13]]  ;;  %v223_v43 = vld [vmem:[#allocation8 + $0xe0] sm:$0xff] }
  0x26   :  { %v95_v33 = vadd.f32 %v94_v26, %v89_v29  ;;  %v141_v52 = vstv %s321_s11  ;;  %v136_v54 = vmul.f32 %v135_v48, %v133_v47  ;;  %s327_s17 = sld [smem:[#allocation6 + $0x14]]  ;;  %v248_v47 = vlaneseq  ;;  %v229_v48 = vld [vmem:[#allocation8 + $0xe8] sm:$0xff] }
  0x27   :  { %v147_v56 = vstv %s322_s12  ;;  %v142_v58 = vmul.f32 %v141_v52, %v139_v51  ;;  %s328_s18 = sld [smem:[#allocation6 + $0x15]]  ;;  %v235_v52 = vld [vmem:[#allocation8 + $0xf0] sm:$0xff] }
  0x28   :  { %v101_v37 = vadd.f32 %v100_v30, %v95_v33  ;;  %v153_v60 = vstv %s323_s13  ;;  %v148_v62 = vmul.f32 %v147_v56, %v145_v55  ;;  %s329_s19 = sld [smem:[#allocation6 + $0x16]]  ;;  %v249_v56 = vshrl.u32 %v248_v47, 7 }
  0x29   :  { %v159_v0 = vstv %s324_s14  ;;  %v154_v2 = vmul.f32 %v153_v60, %v151_v59  ;;  %s330_s20 = sld [smem:[#allocation6 + $0x17]] }
  0x2a   :  { %v107_v41 = vadd.f32 %v106_v34, %v101_v37  ;;  %v165_v4 = vstv %s325_s15  ;;  %v160_v6 = vmul.f32 %v159_v0, %v157_v63  ;;  %s331_s21 = sld [smem:[#allocation6 + $0x18]]  ;;  %vm250_vm0 = vcmp.eq.s32.totalorder %v249_v56, 0 }
  0x2b   :  { %v171_v8 = vstv %s326_s16  ;;  %v166_v10 = vmul.f32 %v165_v4, %v163_v3  ;;  %s332_s22 = sld [smem:[#allocation6 + $0x19]] }
  0x2c   :  { %v113_v45 = vadd.f32 %v112_v38, %v107_v41  ;;  %v177_v12 = vstv %s327_s17  ;;  %v172_v14 = vmul.f32 %v171_v8, %v169_v7  ;;  %s333_s23 = sld [smem:[#allocation6 + $0x1a]] }
  0x2d   :  { %v183_v16 = vstv %s328_s18  ;;  %v178_v18 = vmul.f32 %v177_v12, %v175_v11  ;;  %s334_s24 = sld [smem:[#allocation6 + $0x1b]] }
  0x2e   :  { %v119_v49 = vadd.f32 %v118_v42, %v113_v45  ;;  %v189_v20 = vstv %s329_s19  ;;  %v184_v22 = vmul.f32 %v183_v16, %v181_v15  ;;  %s465_s25 = sld [smem:[#allocation2]] }
  0x2f   :  { %v195_v24 = vstv %s330_s20  ;;  %v190_v26 = vmul.f32 %v189_v20, %v187_v19  ;;  %s335_s0 = sld [smem:[#allocation6 + $0x1c]] }
  0x30   :  { %v125_v53 = vadd.f32 %v124_v46, %v119_v49  ;;  %v201_v28 = vstv %s331_s21  ;;  %v196_v30 = vmul.f32 %v195_v24, %v193_v23  ;;  %s336_s1 = sld [smem:[#allocation6 + $0x1d]] }
  0x31   :  { %v207_v32 = vstv %s332_s22  ;;  %v202_v34 = vmul.f32 %v201_v28, %v199_v27  ;;  %s337_s26 = sld [smem:[#allocation6 + $0x1e]] }
  0x32   :  { %v131_v57 = vadd.f32 %v130_v50, %v125_v53  ;;  %v213_v36 = vstv %s333_s23  ;;  %v208_v38 = vmul.f32 %v207_v32, %v205_v31  ;;  %s338_s27 = sld [smem:[#allocation6 + $0x1f]] }
  0x33   :  { %v219_v40 = vstv %s334_s24  ;;  %v214_v42 = vmul.f32 %v213_v36, %v211_v35  ;;  %s339_s2 = sld [smem:[#allocation2 + $0x1]] }
  0x34   :  { %v137_v61 = vadd.f32 %v136_v54, %v131_v57  ;;  %p251_p0 = scmp.gt.f32.partialorder %s465_s25, 0.5  ;;  %v220_v46 = vmul.f32 %v219_v40, %v217_v39  ;;  %v241_v57 = vld [vmem:[#allocation8 + $0xf8] sm:$0xff] }
  0x35   :  { %v225_v44 = vstv %s335_s0 }
  0x36   :  { %v143_v1 = vadd.f32 %v142_v58, %v137_v61  ;;  %v231_v49 = vstv %s336_s1  ;;  %s252_s28 = scalar_select %p251_p0, 1, 0  ;;  %v226_v51 = vmul.f32 %v225_v44, %v223_v43 }
  0x37   :  { %v237_v53 = vstv %s337_s26  ;;  %v232_v55 = vmul.f32 %v231_v49, %v229_v48 }
  0x38   :  { %v149_v5 = vadd.f32 %v148_v62, %v143_v1  ;;  %v243_v58 = vstv %s338_s27  ;;  %v253_v59 = vstv %s252_s28  ;;  %v238_v61 = vmul.f32 %v237_v53, %v235_v52 }
  0x39   :  { %v244_v63 = vmul.f32 %v243_v58, %v241_v57  ;;  %vm254_vm1 = vcmp.eq.s32.totalorder %v253_v59, 1  ;;  %v256_v1 = vstv %s339_s2 }
  0x3a   :  { %v155_v9 = vadd.f32 %v154_v2, %v149_v5  ;;  %vm255_vm2 = vmand %vm250_vm0, %vm254_vm1 }
  0x3c   :  { %v161_v13 = vadd.f32 %v160_v6, %v155_v9 }
  0x3e   :  { %v167_v17 = vadd.f32 %v166_v10, %v161_v13 }
  0x40   :  { %v173_v21 = vadd.f32 %v172_v14, %v167_v17 }
  0x42   :  { %v179_v25 = vadd.f32 %v178_v18, %v173_v21 }
  0x44   :  { %v185_v29 = vadd.f32 %v184_v22, %v179_v25 }
  0x46   :  { %v191_v33 = vadd.f32 %v190_v26, %v185_v29 }
  0x48   :  { %v197_v37 = vadd.f32 %v196_v30, %v191_v33 }
  0x4a   :  { %v203_v41 = vadd.f32 %v202_v34, %v197_v37 }
  0x4c   :  { %v209_v45 = vadd.f32 %v208_v38, %v203_v41 }
  0x4e   :  { %v215_v50 = vadd.f32 %v214_v42, %v209_v45 }
  0x50   :  { %v221_v54 = vadd.f32 %v220_v46, %v215_v50 }
  0x52   :  { %v227_v60 = vadd.f32 %v226_v51, %v221_v54 }
  0x54   :  { %v233_v62 = vadd.f32 %v232_v55, %v227_v60 }
  0x56   :  { %v239_v0 = vadd.f32 %v238_v61, %v233_v62 }
  0x58   :  { %v245_v2 = vadd.f32 %v244_v63, %v239_v0 }
  0x5a   :  { %v257_v3 = vsel %vm255_vm2, %v256_v1, %v245_v2 }
  0x5b   :  { %v258_v4 = vrot.slane %v257_v3, 4 }
  0x5d   :  { %v259_v5 = vmax.f32 %v257_v3, %v258_v4 }
  0x5f   :  { %v260_v6 = vrot.slane %v259_v5, 2 }
  0x61   :  { %v261_v7 = vmax.f32 %v259_v5, %v260_v6 }
  0x63   :  { %v262_v8 = vrot.slane %v261_v7, 1 }
  0x65   :  { %v263_v9 = vmax.f32 %v261_v7, %v262_v8 }
  0x67   :  { %v264_v10 = vsub.f32 %v257_v3, %v263_v9 }
  0x69   :  { %v265_v11 = vmul.f32 1.442695, %v264_v10 }
  0x6b   :  { %346 = vpow2.f32 %v265_v11 }
  0x71   :  { %v347_v12 = vpop.eup %346 }
  0x72   :  { %v267_v13 = vrot.slane %v347_v12, 4 }
  0x74   :  { %v268_v14 = vadd.f32 %v347_v12, %v267_v13 }
  0x76   :  { %v269_v15 = vrot.slane %v268_v14, 2 }
  0x78   :  { %v270_v16 = vadd.f32 %v269_v15, %v268_v14 }
  0x7a   :  { %v271_v17 = vrot.slane %v270_v16, 1 }
  0x7c   :  { %v272_v18 = vadd.f32 %v271_v17, %v270_v16 }
  0x7e   :  { %348 = vrcp.f32 %v272_v18  ;;  %v284_v21 = vand.u32 2147483648, %v272_v18  ;;  %vm278_vm3 = vweird.f32 %v272_v18  ;;  %v282_v23 = vand.u32 2147483647, %v272_v18 }
  0x80   :  { %v285_v25 = vor.u32 1.1754944e-38, %v284_v21  ;;  %vm283_vm6 = vcmp.eq.f32.partialorder %v282_v23, 8.507059e+37 }
  0x84   :  { %v349_v19 = vpop.eup %348 }
  0x85   :  { %v274_v20 = vmul.f32 %v349_v19, %v272_v18  ;;  %vm279_vm4 = vweird.f32 %v349_v19 }
  0x86   :  { %vm280_vm5 = vmor %vm278_vm3, %vm279_vm4 }
  0x87   :  { %v275_v22 = vsub.f32 1.0, %v274_v20 }
  0x89   :  { %v276_v24 = vmul.f32 %v349_v19, %v275_v22 }
  0x8b   :  { %v277_v26 = vadd.f32 %v349_v19, %v276_v24 }
  0x8d   :  { %v281_v27 = vsel %vm280_vm5, %v349_v19, %v277_v26 }
  0x8e   :  { %v286_v28 = vsel %vm283_vm6, %v285_v25, %v281_v27 }
  0x8f   :  { %v287_v29 = vmul.f32 %v347_v12, %v286_v28 }
  0x91   :  { %288 = vst [vmem:[#allocation9] sm:$0xff] %v287_v29 }
  0x92   :  { %299 = dma.vmem_to_hbm [thread:$0]  %s295_s30, 128, %s297_s6, [#allocation4]  }
  0x93   :  { %428 = dma.done.wait [#allocation4], 128  }
  0x94   :  { %429 = vsyncadd [#allocation4], 4294967168 }
  0x95   :  { %304 = vsyncpa [#allocation3], 1 }
  0x96   :  { %305 = vsyncpa [#allocation4], 1 }
  0x97   :  { %306 = vsyncpa [#allocation5], 1 }
  0x98   :  { %307 = vsyncpa [#allocation7], 1 }

</bundles_post_ra>
